<compile_context>
chip_gen: v6e
topology: v6e:2x2x1
jax: 0.10.0
libtpu: 0.0.40
codegen_flags: <defaults>
</compile_context>

<pallas_src>
import numpy as np
import jax
import jax.numpy as jnp
from jax import lax
from jax.experimental import pallas as pl
from jax.experimental.pallas import tpu as pltpu

# ---- model hyper-parameters (small, consistent with the module) -----------
X_FEAT      = 24     # x_loc.shape[1]
GRID_DIMS   = 8      # grid embedding size (dead path, kept for interface)
DIMS        = 32     # hidden width (divisible by 8 for GroupNorm(8, dims))
NUM_GROUPS  = 8
NUM_GRIDS   = 10     # len(grid_dict)
F_IN        = X_FEAT + GRID_DIMS
EPS         = 1e-5
RRELU_SLOPE = (1.0 / 8.0 + 1.0 / 3.0) / 2.0        # eval-mode RReLU slope
INV_GROUP_SIZE = float(NUM_GROUPS) / float(DIMS)   # 1 / (DIMS // NUM_GROUPS)

# ---- lane packing: 4 batch rows per vreg row -> 128-lane-dense output ------
LANE_PACK = 4
PK_X = LANE_PACK * X_FEAT        # 96   packed input width
PK_D = LANE_PACK * DIMS          # 128  packed hidden / output width
PK_G = LANE_PACK * NUM_GROUPS    # 32   packed group-stat width

# ---- parameter-slab layout (all row offsets 8-aligned; lanes = 128) --------
SLAB_COLS = PK_D                                   # 128
ROW_W1    = 0                                      # block-diag W1   rows   0.. 95
ROW_W2    = ROW_W1 + PK_X                          # block-diag W2   rows  96..223
ROW_GB    = ROW_W2 + PK_D                          # gamma1/beta1/gamma2/beta2 224..227
ROW_G     = ROW_GB + 8                             # block-diag G    rows 232..359
ROW_GT    = ROW_G + PK_D                           # block-diag G.T  rows 360..487
SLAB_ROWS = ROW_GT + PK_D                          # 488  (~244 KiB f32)

TBP_MAX = 256    # max packed rows per grid step (= 1024 batch rows per tile)


def _cdiv(a, b):
    return -(-a // b)


def _round_up(a, b):
    return _cdiv(a, b) * b


def _path_kernel(x_ref, p_ref, o_ref):
    """Whole eval-mode forward for one lane-packed batch tile, fully in VMEM.

    x_ref: (tbp, 96)  = 4 batch rows per sublane row
    p_ref: (488, 128) = parameter slab (block-diagonal replicas)
    o_ref: (tbp, 128) = 4 output rows per sublane row (lane-dense stores)
    """
    w1    = p_ref[ROW_W1:ROW_W1 + PK_X, :]          # (96, 128)  block-diag W1
    w2    = p_ref[ROW_W2:ROW_W2 + PK_D, :]          # (128, 128) block-diag W2
    gamma1 = p_ref[ROW_GB + 0:ROW_GB + 1, :]        # (1, 128)   lane-tiled
    beta1  = p_ref[ROW_GB + 1:ROW_GB + 2, :]
    gamma2 = p_ref[ROW_GB + 2:ROW_GB + 3, :]
    beta2  = p_ref[ROW_GB + 3:ROW_GB + 4, :]
    g_bd   = p_ref[ROW_G:ROW_G + PK_D, :]           # (128, 128) sum scatter (cols>=32 zero)
    g_bdt  = p_ref[ROW_GT:ROW_GT + PK_D, :]         # (128, 128) bcast scatter (rows>=32 zero)

    def block(h, w, gamma, beta):
        # Linear (bias=False in the module)
        y = jnp.dot(h, w, preferred_element_type=jnp.float32)            # (tbp, 128)
        # GroupNorm(8, 32) stats, no lane concats: two MXU pushes.
        sums  = jnp.dot(y, g_bd, preferred_element_type=jnp.float32)     # (tbp, 128) [0:32 live]
        sqsum = jnp.dot(y * y, g_bd, preferred_element_type=jnp.float32)
        mean = sums * INV_GROup_size if False else sums * INV_GROUP_SIZE  # (tbp, 128)
        var  = sqsum * INV_GROUP_SIZE - mean * mean                       # biased variance
        inv  = lax.rsqrt(jnp.maximum(var, 0.0) + EPS)
        # Per-group -> per-channel broadcast: two MXU pushes (dead lanes hit
        # zero rows of g_bdt, so they contribute nothing).
        scale = jnp.dot(inv, g_bdt, preferred_element_type=jnp.float32)          # (tbp, 128)
        shift = jnp.dot(-mean * inv, g_bdt, preferred_element_type=jnp.float32)  # (tbp, 128)
        z = (y * scale + shift) * gamma + beta
        # RReLU eval mode == leaky relu with slope 11/48
        return jnp.where(z >= 0, z, z * RRELU_SLOPE)

    h1 = block(x_ref[...], w1, gamma1, beta1)
    o_ref[...] = block(h1, w2, gamma2, beta2)


def _group_indicator():
    ch = np.arange(DIMS)
    return (ch[:, None] // (DIMS // NUM_GROUPS)
            == np.arange(NUM_GROUPS)[None, :]).astype(np.float32)


def _block_diag(m, reps):
    r, c = m.shape
    out = np.zeros((reps * r, reps * c), np.float32)
    for i in range(reps):
        out[i * r:(i + 1) * r, i * c:(i + 1) * c] = m
    return out


def pack_params(w1, gamma1, beta1, w2, gamma2, beta2):
    """Host-side (numpy) one-time packing of all parameters + GN constants.

    Weights are stored (in, out).  Embedding rows of W1 are dead (multiplied
    by 0 before a bias-free Linear) and dropped.  Everything is replicated
    4x block-diagonally so the kernel works on 4 lane-packed batch rows.
    """
    w1 = np.asarray(w1, np.float32)[:X_FEAT]          # (24, 32)
    w2 = np.asarray(w2, np.float32)                   # (32, 32)
    gmat = _group_indicator()                         # (32, 8)

    slab = np.zeros((SLAB_ROWS, SLAB_COLS), np.float32)
    slab[ROW_W1:ROW_W1 + PK_X, :] = _block_diag(w1, LANE_PACK)        # (96, 128)
    slab[ROW_W2:ROW_W2 + PK_D, :] = _block_diag(w2, LANE_PACK)        # (128, 128)
    slab[ROW_GB + 0, :] = np.tile(np.asarray(gamma1, np.float32), LANE_PACK)
    slab[ROW_GB + 1, :] = np.tile(np.asarray(beta1,  np.float32), LANE_PACK)
    slab[ROW_GB + 2, :] = np.tile(np.asarray(gamma2, np.float32), LANE_PACK)
    slab[ROW_GB + 3, :] = np.tile(np.asarray(beta2,  np.float32), LANE_PACK)
    slab[ROW_G:ROW_G + PK_D, :PK_G] = _block_diag(gmat, LANE_PACK)    # (128, 32) in 128-wide block
    slab[ROW_GT:ROW_GT + PK_G, :]   = _block_diag(gmat.T, LANE_PACK)  # (32, 128), rest rows zero
    return jnp.asarray(slab)


def path_forward(g, x, param_slab):
    """g: (B,) int32 grid ids (unused: Embedding(g)*0 == 0 and Linear1 has no
    bias, so the concatenated columns contribute exactly nothing).
    x: (B, X_FEAT) float32.  param_slab: pack_params(...) output."""
    del g
    bsz = x.shape[0]

    # --- lane-pack 4 batch rows per vreg row (free row-major reshapes) ------
    bp0 = _cdiv(bsz, LANE_PACK)                       # packed rows needed
    # Tile: big enough to amortize per-step overhead (~0.35 us/step) but keep
    # >=2 grid steps when possible so v7x's two TensorCores both get work.
    tbp = min(TBP_MAX, max(8, _round_up(_cdiv(bp0, 2), 8)))
    bp = _round_up(bp0, tbp)                          # padded packed rows
    b_pad = bp * LANE_PACK
    if b_pad != bsz:
        x = jnp.pad(x, ((0, b_pad - bsz), (0, 0)))    # zero rows -> finite junk, sliced off
    xp = x.reshape(bp, PK_X)                          # (bp, 96)

    grid = (bp // tbp,)
    flops_per_row = (2 * PK_X * PK_D + 2 * PK_D * PK_D   # the two Linear matmuls
                     + 8 * 2 * PK_D * PK_D // 2)         # stats + scatter pushes (approx)
    cost = pl.CostEstimate(
        flops=bp * flops_per_row,
        transcendentals=bp * 2 * PK_D,
        bytes_accessed=bp * (PK_X + PK_D) * 4 + SLAB_ROWS * SLAB_COLS * 4)

    # TODO(synk): on v6e/v7x, bf16 x/out HBM copies (f32 accumulation kept via
    # preferred_element_type) would halve DMA bytes; kept f32 here for exact
    # parity with the f32 reference.
    out_p = pl.pallas_call(
        _path_kernel,
        out_shape=jax.ShapeDtypeStruct((bp, PK_D), jnp.float32),
        grid=grid,
        in_specs=[
            pl.BlockSpec((tbp, PK_X), lambda i: (i, 0)),              # x tile
            pl.BlockSpec((SLAB_ROWS, SLAB_COLS), lambda i: (0, 0)),   # params (resident)
        ],
        out_specs=pl.BlockSpec((tbp, PK_D), lambda i: (i, 0)),
        compiler_params=pltpu.CompilerParams(
            dimension_semantics=("parallel",)),   # shards batch tiles over TCs
        cost_estimate=cost,
    )(xp, param_slab)

    return out_p.reshape(b_pad, DIMS)[:bsz]


def path_reference(x, w1, gamma1, beta1, w2, gamma2, beta2):
    """Pure-JAX eval-mode reference (standard two-pass GroupNorm variance)."""
    def gn(y, gamma, beta):
        yg = y.reshape(y.shape[0], NUM_GROUPS, DIMS // NUM_GROUPS)
        mean = yg.mean(axis=-1, keepdims=True)
        var = ((yg - mean) ** 2).mean(axis=-1, keepdims=True)
        z = ((yg - mean) / jnp.sqrt(var + EPS)).reshape(y.shape[0], DIMS)
        return z * gamma[None, :] + beta[None, :]

    def act(z):
        return jnp.where(z >= 0, z, z * RRELU_SLOPE)

    h = act(gn(x @ w1[:X_FEAT], gamma1, beta1))
    return act(gn(h @ w2, gamma2, beta2))


if __name__ == "__main__":
    key = jax.random.PRNGKey(0)
    k_w1, k_w2, k_g1, k_b1, k_g2, k_b2, k_x, k_g = jax.random.split(key, 8)

    # nn.Linear default init ~ U(-1/sqrt(fan_in), 1/sqrt(fan_in)); stored (in, out).
    w1 = jax.random.uniform(k_w1, (F_IN, DIMS), jnp.float32,
                            -1.0 / (F_IN ** 0.5), 1.0 / (F_IN ** 0.5))
    w2 = jax.random.uniform(k_w2, (DIMS, DIMS), jnp.float32,
                            -1.0 / (DIMS ** 0.5), 1.0 / (DIMS ** 0.5))
    # GroupNorm affine (perturbed from the ones/zeros defaults to exercise it).
    gamma1 = 1.0 + 0.1 * jax.random.normal(k_g1, (DIMS,), jnp.float32)
    beta1  = 0.1 * jax.random.normal(k_b1, (DIMS,), jnp.float32)
    gamma2 = 1.0 + 0.1 * jax.random.normal(k_g2, (DIMS,), jnp.float32)
    beta2  = 0.1 * jax.random.normal(k_b2, (DIMS,), jnp.float32)

    B = 8
    x = jax.random.normal(k_x, (B, X_FEAT), jnp.float32)
    g = jax.random.randint(k_g, (B,), 0, NUM_GRIDS, jnp.int32)  # dead input

    slab = pack_params(w1, gamma1, beta1, w2, gamma2, beta2)

    out = path_forward(g, x, slab)
    jax.block_until_ready(out)
    assert out.shape == (B, DIMS) and out.dtype == jnp.float32

    ref = path_reference(x, w1, gamma1, beta1, w2, gamma2, beta2)
    assert jnp.allclose(out, ref, rtol=1e-3, atol=1e-3), \
        float(jnp.max(jnp.abs(out - ref)))

    # TODO(synk): training-mode paths (dropout, random RReLU slope, gaussian
    # noise * gn) are intentionally omitted — eval-mode forward only.
    print("KERNEL_OK")
</pallas_src>

<mosaic_0001>
module attributes {stable_mosaic.version = 11 : i64} {
  func.func @_path_kernel(%arg0: i32, %arg1: memref<8x96xf32, #tpu.memory_space<vmem>>, %arg2: memref<488x128xf32, #tpu.memory_space<vmem>>, %arg3: memref<8x128xf32, #tpu.memory_space<vmem>>) attributes {dimension_semantics = [#tpu.dimension_semantics<parallel>], iteration_bounds = array<i64: 1>, scalar_prefetch = 0 : i64, scratch_operands = 0 : i64, tpu.core_type = #tpu.core_type<tc>, window_params = [{transform_indices = @transform_0, window_bounds = array<i64: 8, 96>}, {pipeline_mode = #tpu.pipeline_mode<synchronous>, transform_indices = @transform_1, window_bounds = array<i64: 488, 128>}, {transform_indices = @transform_2, window_bounds = array<i64: 8, 128>}]} {
    %c0 = arith.constant 0 : index
    %c0_0 = arith.constant 0 : index
    %0 = vector.load %arg2[%c0, %c0_0] : memref<488x128xf32, #tpu.memory_space<vmem>>, vector<96x128xf32>
    %c96 = arith.constant 96 : index
    %c0_1 = arith.constant 0 : index
    %1 = vector.load %arg2[%c96, %c0_1] : memref<488x128xf32, #tpu.memory_space<vmem>>, vector<128x128xf32>
    %c224 = arith.constant 224 : index
    %c0_2 = arith.constant 0 : index
    %2 = vector.load %arg2[%c224, %c0_2] : memref<488x128xf32, #tpu.memory_space<vmem>>, vector<1x128xf32>
    %c225 = arith.constant 225 : index
    %c0_3 = arith.constant 0 : index
    %3 = vector.load %arg2[%c225, %c0_3] : memref<488x128xf32, #tpu.memory_space<vmem>>, vector<1x128xf32>
    %c226 = arith.constant 226 : index
    %c0_4 = arith.constant 0 : index
    %4 = vector.load %arg2[%c226, %c0_4] : memref<488x128xf32, #tpu.memory_space<vmem>>, vector<1x128xf32>
    %c227 = arith.constant 227 : index
    %c0_5 = arith.constant 0 : index
    %5 = vector.load %arg2[%c227, %c0_5] : memref<488x128xf32, #tpu.memory_space<vmem>>, vector<1x128xf32>
    %c232 = arith.constant 232 : index
    %c0_6 = arith.constant 0 : index
    %6 = vector.load %arg2[%c232, %c0_6] : memref<488x128xf32, #tpu.memory_space<vmem>>, vector<128x128xf32>
    %c360 = arith.constant 360 : index
    %c0_7 = arith.constant 0 : index
    %7 = vector.load %arg2[%c360, %c0_7] : memref<488x128xf32, #tpu.memory_space<vmem>>, vector<128x128xf32>
    %c0_8 = arith.constant 0 : index
    %c0_9 = arith.constant 0 : index
    %8 = vector.load %arg1[%c0_8, %c0_9] : memref<8x96xf32, #tpu.memory_space<vmem>>, vector<8x96xf32>
    %cst = arith.constant dense<0.000000e+00> : vector<8x128xf32>
    %9 = tpu.matmul %8, %0, %cst {dimension_numbers = #tpu.dot_dimension_numbers<[1], [0], [0], [1], [0, 0, 1, 1], [], []>} : vector<8x96xf32>, vector<96x128xf32>, vector<8x128xf32> -> vector<8x128xf32>
    %cst_10 = arith.constant dense<0.000000e+00> : vector<8x128xf32>
    %10 = tpu.matmul %9, %6, %cst_10 {dimension_numbers = #tpu.dot_dimension_numbers<[1], [0], [0], [1], [0, 0, 1, 1], [], []>} : vector<8x128xf32>, vector<128x128xf32>, vector<8x128xf32> -> vector<8x128xf32>
    %11 = arith.mulf %9, %9 : vector<8x128xf32>
    %cst_11 = arith.constant dense<0.000000e+00> : vector<8x128xf32>
    %12 = tpu.matmul %11, %6, %cst_11 {dimension_numbers = #tpu.dot_dimension_numbers<[1], [0], [0], [1], [0, 0, 1, 1], [], []>} : vector<8x128xf32>, vector<128x128xf32>, vector<8x128xf32> -> vector<8x128xf32>
    %cst_12 = arith.constant 2.500000e-01 : f32
    %13 = vector.broadcast %cst_12 : f32 to vector<8x128xf32>
    %14 = arith.mulf %10, %13 : vector<8x128xf32>
    %cst_13 = arith.constant 2.500000e-01 : f32
    %15 = vector.broadcast %cst_13 : f32 to vector<8x128xf32>
    %16 = arith.mulf %12, %15 : vector<8x128xf32>
    %17 = arith.mulf %14, %14 : vector<8x128xf32>
    %18 = arith.subf %16, %17 : vector<8x128xf32>
    %cst_14 = arith.constant 0.000000e+00 : f32
    %19 = vector.broadcast %cst_14 : f32 to vector<8x128xf32>
    %20 = arith.maximumf %18, %19 : vector<8x128xf32>
    %cst_15 = arith.constant 9.99999974E-6 : f32
    %21 = vector.broadcast %cst_15 : f32 to vector<8x128xf32>
    %22 = arith.addf %20, %21 : vector<8x128xf32>
    %23 = math.rsqrt %22 : vector<8x128xf32>
    %cst_16 = arith.constant dense<0.000000e+00> : vector<8x128xf32>
    %24 = tpu.matmul %23, %7, %cst_16 {dimension_numbers = #tpu.dot_dimension_numbers<[1], [0], [0], [1], [0, 0, 1, 1], [], []>} : vector<8x128xf32>, vector<128x128xf32>, vector<8x128xf32> -> vector<8x128xf32>
    %cst_17 = arith.constant 0.000000e+00 : f32
    %25 = vector.broadcast %cst_17 : f32 to vector<8x128xf32>
    %26 = arith.subf %25, %14 : vector<8x128xf32>
    %27 = arith.mulf %26, %23 : vector<8x128xf32>
    %cst_18 = arith.constant dense<0.000000e+00> : vector<8x128xf32>
    %28 = tpu.matmul %27, %7, %cst_18 {dimension_numbers = #tpu.dot_dimension_numbers<[1], [0], [0], [1], [0, 0, 1, 1], [], []>} : vector<8x128xf32>, vector<128x128xf32>, vector<8x128xf32> -> vector<8x128xf32>
    %29 = arith.mulf %9, %24 : vector<8x128xf32>
    %30 = arith.addf %29, %28 : vector<8x128xf32>
    %31 = vector.broadcast %2 : vector<1x128xf32> to vector<8x128xf32>
    %32 = arith.mulf %30, %31 : vector<8x128xf32>
    %33 = vector.broadcast %3 : vector<1x128xf32> to vector<8x128xf32>
    %34 = arith.addf %32, %33 : vector<8x128xf32>
    %cst_19 = arith.constant 0.000000e+00 : f32
    %35 = vector.broadcast %cst_19 : f32 to vector<8x128xf32>
    %36 = arith.cmpf oge, %34, %35 : vector<8x128xf32>
    %cst_20 = arith.constant 0.229166672 : f32
    %37 = vector.broadcast %cst_20 : f32 to vector<8x128xf32>
    %38 = arith.mulf %34, %37 : vector<8x128xf32>
    %39 = arith.select %36, %34, %38 : vector<8x128xi1>, vector<8x128xf32>
    %cst_21 = arith.constant dense<0.000000e+00> : vector<8x128xf32>
    %40 = tpu.matmul %39, %1, %cst_21 {dimension_numbers = #tpu.dot_dimension_numbers<[1], [0], [0], [1], [0, 0, 1, 1], [], []>} : vector<8x128xf32>, vector<128x128xf32>, vector<8x128xf32> -> vector<8x128xf32>
    %cst_22 = arith.constant dense<0.000000e+00> : vector<8x128xf32>
    %41 = tpu.matmul %40, %6, %cst_22 {dimension_numbers = #tpu.dot_dimension_numbers<[1], [0], [0], [1], [0, 0, 1, 1], [], []>} : vector<8x128xf32>, vector<128x128xf32>, vector<8x128xf32> -> vector<8x128xf32>
    %42 = arith.mulf %40, %40 : vector<8x128xf32>
    %cst_23 = arith.constant dense<0.000000e+00> : vector<8x128xf32>
    %43 = tpu.matmul %42, %6, %cst_23 {dimension_numbers = #tpu.dot_dimension_numbers<[1], [0], [0], [1], [0, 0, 1, 1], [], []>} : vector<8x128xf32>, vector<128x128xf32>, vector<8x128xf32> -> vector<8x128xf32>
    %cst_24 = arith.constant 2.500000e-01 : f32
    %44 = vector.broadcast %cst_24 : f32 to vector<8x128xf32>
    %45 = arith.mulf %41, %44 : vector<8x128xf32>
    %cst_25 = arith.constant 2.500000e-01 : f32
    %46 = vector.broadcast %cst_25 : f32 to vector<8x128xf32>
    %47 = arith.mulf %43, %46 : vector<8x128xf32>
    %48 = arith.mulf %45, %45 : vector<8x128xf32>
    %49 = arith.subf %47, %48 : vector<8x128xf32>
    %cst_26 = arith.constant 0.000000e+00 : f32
    %50 = vector.broadcast %cst_26 : f32 to vector<8x128xf32>
    %51 = arith.maximumf %49, %50 : vector<8x128xf32>
    %cst_27 = arith.constant 9.99999974E-6 : f32
    %52 = vector.broadcast %cst_27 : f32 to vector<8x128xf32>
    %53 = arith.addf %51, %52 : vector<8x128xf32>
    %54 = math.rsqrt %53 : vector<8x128xf32>
    %cst_28 = arith.constant dense<0.000000e+00> : vector<8x128xf32>
    %55 = tpu.matmul %54, %7, %cst_28 {dimension_numbers = #tpu.dot_dimension_numbers<[1], [0], [0], [1], [0, 0, 1, 1], [], []>} : vector<8x128xf32>, vector<128x128xf32>, vector<8x128xf32> -> vector<8x128xf32>
    %cst_29 = arith.constant 0.000000e+00 : f32
    %56 = vector.broadcast %cst_29 : f32 to vector<8x128xf32>
    %57 = arith.subf %56, %45 : vector<8x128xf32>
    %58 = arith.mulf %57, %54 : vector<8x128xf32>
    %cst_30 = arith.constant dense<0.000000e+00> : vector<8x128xf32>
    %59 = tpu.matmul %58, %7, %cst_30 {dimension_numbers = #tpu.dot_dimension_numbers<[1], [0], [0], [1], [0, 0, 1, 1], [], []>} : vector<8x128xf32>, vector<128x128xf32>, vector<8x128xf32> -> vector<8x128xf32>
    %60 = arith.mulf %40, %55 : vector<8x128xf32>
    %61 = arith.addf %60, %59 : vector<8x128xf32>
    %62 = vector.broadcast %4 : vector<1x128xf32> to vector<8x128xf32>
    %63 = arith.mulf %61, %62 : vector<8x128xf32>
    %64 = vector.broadcast %5 : vector<1x128xf32> to vector<8x128xf32>
    %65 = arith.addf %63, %64 : vector<8x128xf32>
    %cst_31 = arith.constant 0.000000e+00 : f32
    %66 = vector.broadcast %cst_31 : f32 to vector<8x128xf32>
    %67 = arith.cmpf oge, %65, %66 : vector<8x128xf32>
    %cst_32 = arith.constant 0.229166672 : f32
    %68 = vector.broadcast %cst_32 : f32 to vector<8x128xf32>
    %69 = arith.mulf %65, %68 : vector<8x128xf32>
    %70 = arith.select %67, %65, %69 : vector<8x128xi1>, vector<8x128xf32>
    %c0_33 = arith.constant 0 : index
    %c0_34 = arith.constant 0 : index
    %71 = vector.load %arg3[%c0_33, %c0_34] : memref<8x128xf32, #tpu.memory_space<vmem>>, vector<8x128xf32>
    tpu.vector_store %arg3[%c0_33, %c0_34], %70 {strides = array<i32>} : memref<8x128xf32, #tpu.memory_space<vmem>>, vector<8x128xf32>,
    return
  }
  func.func @transform_0(%arg0: i32) -> (i32, i32) {
    %c0_i32 = arith.constant 0 : i32
    %c0_i32_0 = arith.constant 0 : i32
    return %arg0, %c0_i32 : i32, i32
  }
  func.func @transform_1(%arg0: i32) -> (i32, i32) {
    %c0_i32 = arith.constant 0 : i32
    %c0_i32_0 = arith.constant 0 : i32
    %c0_i32_1 = arith.constant 0 : i32
    return %c0_i32, %c0_i32_0 : i32, i32
  }
  func.func @transform_2(%arg0: i32) -> (i32, i32) {
    %c0_i32 = arith.constant 0 : i32
    %c0_i32_0 = arith.constant 0 : i32
    return %arg0, %c0_i32 : i32, i32
  }
}

</mosaic_0001>

<bundles_post_ra>
// kernel: tpu_custom_call.1
= control target key start
LH: loop header
LB: loop body
LE: loop exit
PB: predicated region body
PF: predicated region fallthrough
CT: control target
= control target key end

     0   :  { %7 = vsyncpa [#allocation3], 0  ;;  %s1875_s0 = inlined_call_operand.hbm [shape: f32[8,96], index: 0, kind: input, shape index: {}]   ;;  %s1876_s1 = inlined_call_operand.hbm [shape: f32[488,128], index: 1, kind: input, shape index: {}]   ;;  %s1877_s2 = inlined_call_operand.hbm [shape: f32[8,128], index: 2, kind: output, shape index: {}]  }
   0x1   :  { %8 = vsyncpa [#allocation6], 0 }
   0x2   :  { %9 = vsyncpa [#allocation4], 0  ;;  %s1464_s9 = smov [#allocation2]   ;;  %s1465_s11 = smov [#allocation5]  }
   0x3   :  { %s16_s10 = sshll.u32 %s1464_s9, 4  ;;  %s25_s12 = sshll.u32 %s1465_s11, 4  ;;  %s17_s10 = int_to_ptr.vmem [resolvable:$true] %s16_s10  ;;  %s26_s12 = int_to_ptr.vmem [resolvable:$true] %s25_s12 }
   0x4   :  { %s1406_s13 = scalar_lea.vmem %s17_s10, 128  ;;  %p1411_p1 = scmp.lt.s32.totalorder %s17_s10, %s17_s10 }
   0x5   :  { %p1407_p0 = scmp.ne.s32.totalorder %s17_s10, %s1406_s13  ;;  %p1412_p2 = scmp.lt.s32.totalorder %s1406_s13, %s1406_s13 }
   0x7   :  { %p1413_p3 = por %p1412_p2, %p1411_p1 }
   0x9   :  { %p1414_p4 = pnand %p1413_p3, %p1407_p0 }
   0xb   :  { %1417 = shalt.err (!%p1414_p4)
}
   0xc   :  { %19 = dma.hbm_to_vmem [thread:$0]  %s1875_s0, 128, %s17_s10, [#allocation3]  }
   0xd   :  { %s1426_s16 = scalar_lea.vmem %s26_s12, 7808  ;;  %p1431_p6 = scmp.lt.s32.totalorder %s26_s12, %s26_s12 }
   0xe   :  { %p1427_p5 = scmp.ne.s32.totalorder %s26_s12, %s1426_s16  ;;  %p1432_p7 = scmp.lt.s32.totalorder %s1426_s16, %s1426_s16 }
  0x10   :  { %p1433_p8 = por %p1432_p7, %p1431_p6 }
  0x12   :  { %p1434_p9 = pnand %p1433_p8, %p1427_p5 }
  0x14   :  { %1437 = shalt.err (!%p1434_p9)
}
  0x15   :  { %s1466_s17 = smov 128   ;;  %s1467_s18 = smov 8  }
  0x16   :  { %31 = dma.hbm_to_vmem [thread:$0]  %s1876_s1, 7808, %s26_s12, [#allocation6], %s1466_s17, %s1466_s17, %s1467_s18  }
  0x17   :  { %1458 = dma.done.wait [#allocation3], 128  }
  0x18   :  { %1459 = vsyncadd [#allocation3], 4294967168 }
  0x19   :  { %1460 = dma.done.wait [#allocation6], 7808  }
  0x1a   :  { %1461 = vsyncadd [#allocation6], 4294959488  ;;  %v1468_v0 = vmov 0.0   ;;  %vm1469_vm0 = vmmov 0   ;;  %v49_v1 = vld [vmem:[#allocation5 + $0x58] sm:$0xff]  ;;  %v48_v2 = vld [vmem:[#allocation5 + $0x50] sm:$0xff] }
  0x1b   :  { %1045 = vmatprep.subr.mxu0 %v1468_v0  ;;  %1069 = vmatprep.mubr.msk.f32.mxu0 %vm1469_vm0, %v1468_v0  ;;  %v47_v3 = vld [vmem:[#allocation5 + $0x48] sm:$0xff]  ;;  %v46_v4 = vld [vmem:[#allocation5 + $0x40] sm:$0xff]  ;;  %v1502_v6 = vld [vmem:[#allocation5 + $0x158] sm:$0xff]  ;;  %vm103_vm1 = vcmask 785408   ;;  %s1470_s0 = smov [#allocation7]  }
  0x1c   :  { %1072 = vmatprep.subr.mxu1 %v1468_v0  ;;  %1104 = vmatprep.mubr.msk.f32.mxu1 %vm1469_vm0, %v1468_v0  ;;  %v1500_v5 = vld [vmem:[#allocation5 + $0x160] sm:$0xff]  ;;  %v45_v7 = vld [vmem:[#allocation5 + $0x38] sm:$0xff]  ;;  %v1507_v8 = vld [vmem:[#allocation5 + $0x150] sm:$0xff]  ;;  %s864_s1 = sshll.u32 %s1470_s0, 4  ;;  %s865_s1 = int_to_ptr.vmem [resolvable:$true] %s864_s1 }
  0x1d   :  { %1046 = vmatpush3.msra.mxu0 %v49_v1  ;;  %1073 = vmatpush3.msra.mxu1 %v1500_v5  ;;  %v44_v9 = vld [vmem:[#allocation5 + $0x30] sm:$0xff]  ;;  %v1512_v10 = vld [vmem:[#allocation5 + $0x148] sm:$0xff]  ;;  %v1517_v12 = vld [vmem:[#allocation5 + $0x140] sm:$0xff]  ;;  %s1438_s21 = scalar_lea.vmem %s865_s1, 128  ;;  %p1443_p11 = scmp.lt.s32.totalorder %s865_s1, %s865_s1 }
  0x1e   :  { %1047 = vmatprep.subr.mxu0 %v1468_v0  ;;  %1074 = vmatprep.subr.mxu1 %v1468_v0  ;;  %v43_v11 = vld [vmem:[#allocation5 + $0x28] sm:$0xff]  ;;  %v42_v13 = vld [vmem:[#allocation5 + $0x20] sm:$0xff]  ;;  %v1522_v14 = vld [vmem:[#allocation5 + $0x138] sm:$0xff]  ;;  %p1439_p10 = scmp.ne.s32.totalorder %s865_s1, %s1438_s21  ;;  %p1444_p12 = scmp.lt.s32.totalorder %s1438_s21, %s1438_s21 }
  0x1f   :  { %1048 = vmatpush3.msra.mxu0 %v48_v2  ;;  %1075 = vmatpush3.msra.mxu1 %v1502_v6  ;;  %v41_v15 = vld [vmem:[#allocation5 + $0x18] sm:$0xff]  ;;  %v1527_v16 = vld [vmem:[#allocation5 + $0x130] sm:$0xff]  ;;  %v1532_v18 = vld [vmem:[#allocation5 + $0x128] sm:$0xff] }
  0x20   :  { %1049 = vmatprep.subr.mxu0 %v1468_v0  ;;  %1076 = vmatprep.subr.mxu1 %v1468_v0  ;;  %v40_v17 = vld [vmem:[#allocation5 + $0x10] sm:$0xff]  ;;  %v39_v19 = vld [vmem:[#allocation5 + $0x8] sm:$0xff]  ;;  %v1537_v20 = vld [vmem:[#allocation5 + $0x120] sm:$0xff]  ;;  %p1445_p13 = por %p1444_p12, %p1443_p11 }
  0x21   :  { %1050 = vmatpush3.msra.mxu0 %v47_v3  ;;  %1077 = vmatpush3.msra.mxu1 %v1507_v8  ;;  %v38_v21 = vld [vmem:[#allocation5] sm:$0xff]  ;;  %v1542_v22 = vld [vmem:[#allocation5 + $0x118] sm:$0xff]  ;;  %v1548_v24 = vld [vmem:[#allocation5 + $0x110] sm:$0xff] }
  0x22   :  { %1051 = vmatprep.subr.mxu0 %v1468_v0  ;;  %1078 = vmatprep.subr.mxu1 %v1468_v0  ;;  %v102_v23 = vld [vmem:[#allocation2] sm:$0xff]  ;;  %v1553_v25 = vld [vmem:[#allocation5 + $0x108] sm:$0xff]  ;;  %v1559_v26 = vld [vmem:[#allocation5 + $0x100] sm:$0xff]  ;;  %p1446_p0 = pnand %p1445_p13, %p1439_p10 }
  0x23   :  { %1052 = vmatpush3.msra.mxu0 %v46_v4  ;;  %1079 = vmatpush3.msra.mxu1 %v1512_v10  ;;  %v1565_v27 = vld [vmem:[#allocation5 + $0xf8] sm:$0xff]  ;;  %v1571_v28 = vld [vmem:[#allocation5 + $0xf0] sm:$0xff]  ;;  %v1602_v29 = vld [vmem:[#allocation5 + $0xe8] sm:$0xff] }
  0x24   :  { %1053 = vmatprep.subr.mxu0 %v1468_v0  ;;  %1080 = vmatprep.subr.mxu1 %v1468_v0  ;;  %v1608_v30 = vld [vmem:[#allocation5 + $0x1e0] sm:$0xff]  ;;  %v1615_v33 = vld [vmem:[#allocation5 + $0x1d8] sm:$0xff]  ;;  %v1621_v35 = vld [vmem:[#allocation5 + $0x1d0] sm:$0xff] }
  0x25   :  { %1054 = vmatpush3.msra.mxu0 %v45_v7  ;;  %1081 = vmatpush3.msra.mxu1 %v1517_v12  ;;  %v1635_v36 = vld [vmem:[#allocation5 + $0x1c8] sm:$0xff]  ;;  %v1640_v37 = vld [vmem:[#allocation5 + $0x1c0] sm:$0xff]  ;;  %v1646_v38 = vld [vmem:[#allocation5 + $0x1b8] sm:$0xff] }
  0x26   :  { %1055 = vmatprep.subr.mxu0 %v1468_v0  ;;  %1082 = vmatprep.subr.mxu1 %v1468_v0  ;;  %v1652_v39 = vld [vmem:[#allocation5 + $0x1b0] sm:$0xff]  ;;  %v1658_v40 = vld [vmem:[#allocation5 + $0x1a8] sm:$0xff]  ;;  %v1664_v41 = vld [vmem:[#allocation5 + $0x1a0] sm:$0xff] }
  0x27   :  { %1056 = vmatpush3.msra.mxu0 %v44_v9  ;;  %1083 = vmatpush3.msra.mxu1 %v1522_v14  ;;  %v1670_v42 = vld [vmem:[#allocation5 + $0x198] sm:$0xff]  ;;  %v1673_v43 = vld [vmem:[#allocation5 + $0x190] sm:$0xff]  ;;  %v1679_v44 = vld [vmem:[#allocation5 + $0x188] sm:$0xff] }
  0x28   :  { %1057 = vmatprep.subr.mxu0 %v1468_v0  ;;  %1084 = vmatprep.subr.mxu1 %v1468_v0  ;;  %v1685_v45 = vld [vmem:[#allocation5 + $0x180] sm:$0xff]  ;;  %v1691_v46 = vld [vmem:[#allocation5 + $0x178] sm:$0xff]  ;;  %v1697_v47 = vld [vmem:[#allocation5 + $0x170] sm:$0xff] }
  0x29   :  { %1058 = vmatpush3.msra.mxu0 %v43_v11  ;;  %1085 = vmatpush3.msra.mxu1 %v1527_v16  ;;  %v1703_v48 = vld [vmem:[#allocation5 + $0x168] sm:$0xff]  ;;  %v65_v60 = vld [vmem:[#allocation5 + $0xd8] sm:$0xff]  ;;  %v64_v63 = vld [vmem:[#allocation5 + $0xd0] sm:$0xff] }
  0x2a   :  { %1059 = vmatprep.subr.mxu0 %v1468_v0  ;;  %1086 = vmatprep.subr.mxu1 %v1468_v0  ;;  %v63_v1 = vld [vmem:[#allocation5 + $0xc8] sm:$0xff]  ;;  %v62_v2 = vld [vmem:[#allocation5 + $0xc0] sm:$0xff]  ;;  %v61_v3 = vld [vmem:[#allocation5 + $0xb8] sm:$0xff] }
  0x2b   :  { %1060 = vmatpush3.msra.mxu0 %v42_v13  ;;  %1087 = vmatpush3.msra.mxu1 %v1532_v18  ;;  %v60_v4 = vld [vmem:[#allocation5 + $0xb0] sm:$0xff]  ;;  %v59_v7 = vld [vmem:[#allocation5 + $0xa8] sm:$0xff]  ;;  %v58_v9 = vld [vmem:[#allocation5 + $0xa0] sm:$0xff] }
  0x2c   :  { %1061 = vmatprep.subr.mxu0 %v1468_v0  ;;  %1088 = vmatprep.subr.mxu1 %v1468_v0  ;;  %v57_v11 = vld [vmem:[#allocation5 + $0x98] sm:$0xff]  ;;  %v56_v13 = vld [vmem:[#allocation5 + $0x90] sm:$0xff] }
  0x2d   :  { %1062 = vmatpush3.msra.mxu0 %v41_v15  ;;  %1089 = vmatpush3.msra.mxu1 %v1537_v20  ;;  %v55_v15 = vld [vmem:[#allocation5 + $0x88] sm:$0xff] }
  0x2e   :  { %1063 = vmatprep.subr.mxu0 %v1468_v0  ;;  %1090 = vmatprep.subr.mxu1 %v1468_v0 }
  0x2f   :  { %1064 = vmatpush3.msra.mxu0 %v40_v17  ;;  %1091 = vmatpush3.msra.mxu1 %v1542_v22  ;;  %v54_v17 = vld [vmem:[#allocation5 + $0x80] sm:$0xff] }
  0x30   :  { %1065 = vmatprep.subr.mxu0 %v1468_v0  ;;  %1092 = vmatprep.subr.mxu1 %v1468_v0 }
  0x31   :  { %1066 = vmatpush3.msra.mxu0 %v39_v19  ;;  %1093 = vmatpush3.msra.mxu1 %v1548_v24  ;;  %v53_v19 = vld [vmem:[#allocation5 + $0x78] sm:$0xff] }
  0x32   :  { %1067 = vmatprep.subr.mxu0 %v1468_v0  ;;  %1094 = vmatprep.subr.mxu1 %v1468_v0 }
  0x33   :  { %1068 = vmatpush3.msra.mxu0 %v38_v21  ;;  %1095 = vmatpush3.msra.mxu1 %v1553_v25  ;;  %v52_v21 = vld [vmem:[#allocation5 + $0x70] sm:$0xff] }
  0x34   :  { %1070 = vmatmul.mubr.msk.f32.vlgmr.msra.gmra.mxu0 %vm103_vm1, %v102_v23  ;;  %1107 = vmatprep.subr.mxu0 %v1468_v0  ;;  %v51_v23 = vld [vmem:[#allocation5 + $0x68] sm:$0xff] }
  0x35   :  { %1108 = vmatpush3.msra.mxu0 %v1500_v5  ;;  %1096 = vmatprep.subr.mxu1 %v1468_v0 }
  0x36   :  { %1109 = vmatprep.subr.mxu0 %v1468_v0  ;;  %1097 = vmatpush3.msra.mxu1 %v1559_v26 }
  0x37   :  { %1110 = vmatpush3.msra.mxu0 %v1502_v6  ;;  %1098 = vmatprep.subr.mxu1 %v1468_v0 }
  0x38   :  { %1111 = vmatprep.subr.mxu0 %v1468_v0  ;;  %1099 = vmatpush3.msra.mxu1 %v1565_v27 }
  0x39   :  { %1112 = vmatpush3.msra.mxu0 %v1507_v8  ;;  %1100 = vmatprep.subr.mxu1 %v1468_v0 }
  0x3a   :  { %1113 = vmatprep.subr.mxu0 %v1468_v0  ;;  %1101 = vmatpush3.msra.mxu1 %v1571_v28 }
  0x3b   :  { %1114 = vmatpush3.msra.mxu0 %v1512_v10  ;;  %1102 = vmatprep.subr.mxu1 %v1468_v0 }
  0x3c   :  { %1115 = vmatprep.subr.mxu0 %v1468_v0  ;;  %1139 = vmatprep.mubr.msk.f32.mxu0 %vm1469_vm0, %v1468_v0 }
  0x3d   :  { %1116 = vmatpush3.msra.mxu0 %v1517_v12  ;;  %1103 = vmatpush3.msra.mxu1 %v1602_v29 }
  0x3e   :  { %1117 = vmatprep.subr.mxu0 %v1468_v0  ;;  %1142 = vmatprep.subr.mxu1 %v1468_v0 }
  0x3f   :  { %1118 = vmatpush3.msra.mxu0 %v1522_v14 }
  0x40   :  { %1119 = vmatprep.subr.mxu0 %v1468_v0 }
  0x41   :  { %1120 = vmatpush3.msra.mxu0 %v1527_v16 }
  0x42   :  { %1121 = vmatprep.subr.mxu0 %v1468_v0 }
  0x43   :  { %1122 = vmatpush3.msra.mxu0 %v1532_v18 }
  0x44   :  { %1123 = vmatprep.subr.mxu0 %v1468_v0 }
  0x45   :  { %1124 = vmatpush3.msra.mxu0 %v1537_v20 }
  0x46   :  { %1125 = vmatprep.subr.mxu0 %v1468_v0 }
  0x47   :  { %1126 = vmatpush3.msra.mxu0 %v1542_v22 }
  0x48   :  { %1127 = vmatprep.subr.mxu0 %v1468_v0 }
  0x49   :  { %1128 = vmatpush3.msra.mxu0 %v1548_v24 }
  0x4a   :  { %1129 = vmatprep.subr.mxu0 %v1468_v0 }
  0x4b   :  { %1130 = vmatpush3.msra.mxu0 %v1553_v25 }
  0x4c   :  { %1131 = vmatprep.subr.mxu0 %v1468_v0 }
  0x4d   :  { %1132 = vmatpush3.msra.mxu0 %v1559_v26 }
  0x4e   :  { %1133 = vmatprep.subr.mxu0 %v1468_v0 }
  0x4f   :  { %1134 = vmatpush3.msra.mxu0 %v1565_v27 }
  0x50   :  { %1135 = vmatprep.subr.mxu0 %v1468_v0 }
  0x51   :  { %1136 = vmatpush3.msra.mxu0 %v1571_v28 }
  0x52   :  { %1137 = vmatprep.subr.mxu0 %v1468_v0 }
  0x53   :  { %1138 = vmatpush3.msra.mxu0 %v1602_v29 }
  0x54   :  { %1177 = vmatprep.subr.mxu0 %v1468_v0 }
  0xf4   :  { %v1610_v31 = vpop.f32.mrf.mxu0 }
  0xf5   :  { %v247_v32 = vmul.f32 %v1610_v31, %v1610_v31  ;;  %1105 = vmatmul.mubr.f32.vlgmr.msra.gmra.mxu1 %v1610_v31 }
  0xf6   :  { %v1071_v34 = vpop.f32.mrf.mxu0  ;;  %1143 = vmatpush3.msra.mxu1 %v1608_v30  ;;  %1174 = vmatprep.mubr.msk.f32.mxu1 %vm1469_vm0, %v1468_v0 }
  0xf7   :  { %1140 = vmatmul.mubr.f32.vlgmr.msra.gmra.mxu0 %v247_v32  ;;  %1144 = vmatprep.subr.mxu1 %v1468_v0  ;;  %v50_v32 = vld [vmem:[#allocation5 + $0x60] sm:$0xff] }
  0xf8   :  { %1145 = vmatpush3.msra.mxu1 %v1615_v33  ;;  %1178 = vmatpush3.msra.mxu0 %v1608_v30 }
  0xf9   :  { %1146 = vmatprep.subr.mxu1 %v1468_v0  ;;  %1179 = vmatprep.subr.mxu0 %v1468_v0 }
  0xfa   :  { %1147 = vmatpush3.msra.mxu1 %v1621_v35  ;;  %1180 = vmatpush3.msra.mxu0 %v1615_v33 }
  0xfb   :  { %1148 = vmatprep.subr.mxu1 %v1468_v0  ;;  %1181 = vmatprep.subr.mxu0 %v1468_v0 }
  0xfc   :  { %1182 = vmatpush3.msra.mxu0 %v1621_v35  ;;  %1209 = vmatprep.mubr.msk.f32.mxu0 %vm1469_vm0, %v1468_v0 }
  0xfd   :  { %1183 = vmatprep.subr.mxu0 %v1468_v0  ;;  %1149 = vmatpush3.msra.mxu1 %v1635_v36 }
  0xfe   :  { %1184 = vmatpush3.msra.mxu0 %v1635_v36  ;;  %1150 = vmatprep.subr.mxu1 %v1468_v0 }
  0xff   :  { %1185 = vmatprep.subr.mxu0 %v1468_v0  ;;  %1151 = vmatpush3.msra.mxu1 %v1640_v37 }
 0x100   :  { %1186 = vmatpush3.msra.mxu0 %v1640_v37  ;;  %1152 = vmatprep.subr.mxu1 %v1468_v0 }
 0x101   :  { %1187 = vmatprep.subr.mxu0 %v1468_v0  ;;  %1153 = vmatpush3.msra.mxu1 %v1646_v38 }
 0x102   :  { %1188 = vmatpush3.msra.mxu0 %v1646_v38  ;;  %1154 = vmatprep.subr.mxu1 %v1468_v0 }
 0x103   :  { %1189 = vmatprep.subr.mxu0 %v1468_v0  ;;  %1155 = vmatpush3.msra.mxu1 %v1652_v39 }
 0x104   :  { %1190 = vmatpush3.msra.mxu0 %v1652_v39  ;;  %1156 = vmatprep.subr.mxu1 %v1468_v0 }
 0x105   :  { %1191 = vmatprep.subr.mxu0 %v1468_v0  ;;  %1157 = vmatpush3.msra.mxu1 %v1658_v40 }
 0x106   :  { %1192 = vmatpush3.msra.mxu0 %v1658_v40  ;;  %1158 = vmatprep.subr.mxu1 %v1468_v0 }
 0x107   :  { %1193 = vmatprep.subr.mxu0 %v1468_v0  ;;  %1159 = vmatpush3.msra.mxu1 %v1664_v41 }
 0x108   :  { %1194 = vmatpush3.msra.mxu0 %v1664_v41  ;;  %1160 = vmatprep.subr.mxu1 %v1468_v0 }
 0x109   :  { %1195 = vmatprep.subr.mxu0 %v1468_v0  ;;  %1161 = vmatpush3.msra.mxu1 %v1670_v42 }
 0x10a   :  { %1196 = vmatpush3.msra.mxu0 %v1670_v42  ;;  %1162 = vmatprep.subr.mxu1 %v1468_v0 }
 0x10b   :  { %1197 = vmatprep.subr.mxu0 %v1468_v0  ;;  %1163 = vmatpush3.msra.mxu1 %v1673_v43 }
 0x10c   :  { %1198 = vmatpush3.msra.mxu0 %v1673_v43  ;;  %1164 = vmatprep.subr.mxu1 %v1468_v0 }
 0x10d   :  { %1199 = vmatprep.subr.mxu0 %v1468_v0  ;;  %1165 = vmatpush3.msra.mxu1 %v1679_v44 }
 0x10e   :  { %1200 = vmatpush3.msra.mxu0 %v1679_v44  ;;  %1166 = vmatprep.subr.mxu1 %v1468_v0 }
 0x10f   :  { %1201 = vmatprep.subr.mxu0 %v1468_v0  ;;  %1167 = vmatpush3.msra.mxu1 %v1685_v45 }
 0x110   :  { %1202 = vmatpush3.msra.mxu0 %v1685_v45  ;;  %1168 = vmatprep.subr.mxu1 %v1468_v0 }
 0x111   :  { %1203 = vmatprep.subr.mxu0 %v1468_v0  ;;  %1169 = vmatpush3.msra.mxu1 %v1691_v46 }
 0x112   :  { %1204 = vmatpush3.msra.mxu0 %v1691_v46  ;;  %1170 = vmatprep.subr.mxu1 %v1468_v0 }
 0x113   :  { %1205 = vmatprep.subr.mxu0 %v1468_v0  ;;  %1171 = vmatpush3.msra.mxu1 %v1697_v47 }
 0x114   :  { %1206 = vmatpush3.msra.mxu0 %v1697_v47  ;;  %1172 = vmatprep.subr.mxu1 %v1468_v0 }
 0x115   :  { %1207 = vmatprep.subr.mxu0 %v1468_v0  ;;  %1173 = vmatpush3.msra.mxu1 %v1703_v48 }
 0x116   :  { %1208 = vmatpush3.msra.mxu0 %v1703_v48  ;;  %1212 = vmatprep.subr.mxu1 %v1468_v0 }
 0x117   :  { %1247 = vmatprep.subr.mxu0 %v1468_v0 }
 0x1b5   :  { %v243_v49 = vpop.f32.mrf.mxu1 }
 0x1b6   :  { %v318_v50 = vmul.f32 0.25, %v243_v49 }
 0x1b7   :  { %v1106_v51 = vpop.f32.mrf.mxu1  ;;  %v314_v52 = vpop.f32.mrf.mxu0 }
 0x1b8   :  { %v320_v53 = vmul.f32 %v318_v50, %v318_v50  ;;  %v319_v54 = vmul.f32 0.25, %v314_v52  ;;  %v395_v59 = vsub.f32 0.0, %v318_v50  ;;  %v875_v51 = vld [vmem:[#allocation5 + $0xe0] ss:$0 sm:$0xff] }
 0x1b9   :  { %v1141_v55 = vpop.f32.mrf.mxu0 }
 0x1ba   :  { %v321_v56 = vsub.f32 %v319_v54, %v320_v53  ;;  %v876_v54 = vld [vmem:[#allocation5 + $0xe1] ss:$0 sm:$0xff] }
 0x1bc   :  { %v322_v57 = vmax.f32 %v321_v56, 0.0 }
 0x1be   :  { %v323_v58 = vadd.f32 1e-05, %v322_v57 }
 0x1c0   :  { %1394 = vrsqrt.f32 %v323_v58 }
 0x1cd   :  { %v1395_v61 = vpop.eup %1394 }
 0x1ce   :  { %1175 = vmatmul.mubr.f32.vlgmr.msra.gmra.mxu1 %v1395_v61  ;;  %v396_v62 = vmul.f32 %v1395_v61, %v395_v59 }
 0x1cf   :  { %1213 = vmatpush3.msra.mxu1 %v65_v60  ;;  %1244 = vmatprep.mubr.msk.f32.mxu1 %vm1469_vm0, %v1468_v0 }
 0x1d0   :  { %1210 = vmatmul.mubr.f32.vlgmr.msra.gmra.mxu0 %v396_v62  ;;  %1214 = vmatprep.subr.mxu1 %v1468_v0 }
 0x1d1   :  { %1215 = vmatpush3.msra.mxu1 %v64_v63  ;;  %1248 = vmatpush3.msra.mxu0 %v1500_v5 }
 0x1d2   :  { %1216 = vmatprep.subr.mxu1 %v1468_v0  ;;  %1249 = vmatprep.subr.mxu0 %v1468_v0 }
 0x1d3   :  { %1217 = vmatpush3.msra.mxu1 %v63_v1  ;;  %1250 = vmatpush3.msra.mxu0 %v1502_v6 }
 0x1d4   :  { %1218 = vmatprep.subr.mxu1 %v1468_v0  ;;  %1251 = vmatprep.subr.mxu0 %v1468_v0 }
 0x1d5   :  { %1219 = vmatpush3.msra.mxu1 %v62_v2  ;;  %1252 = vmatpush3.msra.mxu0 %v1507_v8 }
 0x1d6   :  { %1220 = vmatprep.subr.mxu1 %v1468_v0  ;;  %1253 = vmatprep.subr.mxu0 %v1468_v0 }
 0x1d7   :  { %1221 = vmatpush3.msra.mxu1 %v61_v3  ;;  %1254 = vmatpush3.msra.mxu0 %v1512_v10 }
 0x1d8   :  { %1222 = vmatprep.subr.mxu1 %v1468_v0  ;;  %1255 = vmatprep.subr.mxu0 %v1468_v0 }
 0x1d9   :  { %1223 = vmatpush3.msra.mxu1 %v60_v4  ;;  %1256 = vmatpush3.msra.mxu0 %v1517_v12 }
 0x1da   :  { %1224 = vmatprep.subr.mxu1 %v1468_v0  ;;  %1257 = vmatprep.subr.mxu0 %v1468_v0 }
 0x1db   :  { %1225 = vmatpush3.msra.mxu1 %v59_v7  ;;  %1258 = vmatpush3.msra.mxu0 %v1522_v14 }
 0x1dc   :  { %1226 = vmatprep.subr.mxu1 %v1468_v0  ;;  %1259 = vmatprep.subr.mxu0 %v1468_v0 }
 0x1dd   :  { %1227 = vmatpush3.msra.mxu1 %v58_v9  ;;  %1260 = vmatpush3.msra.mxu0 %v1527_v16 }
 0x1de   :  { %1228 = vmatprep.subr.mxu1 %v1468_v0  ;;  %1261 = vmatprep.subr.mxu0 %v1468_v0 }
 0x1df   :  { %1229 = vmatpush3.msra.mxu1 %v57_v11  ;;  %1262 = vmatpush3.msra.mxu0 %v1532_v18 }
 0x1e0   :  { %1230 = vmatprep.subr.mxu1 %v1468_v0  ;;  %1263 = vmatprep.subr.mxu0 %v1468_v0 }
 0x1e1   :  { %1231 = vmatpush3.msra.mxu1 %v56_v13  ;;  %1264 = vmatpush3.msra.mxu0 %v1537_v20 }
 0x1e2   :  { %1232 = vmatprep.subr.mxu1 %v1468_v0  ;;  %1265 = vmatprep.subr.mxu0 %v1468_v0 }
 0x1e3   :  { %1266 = vmatpush3.msra.mxu0 %v1542_v22  ;;  %1279 = vmatprep.mubr.msk.f32.mxu0 %vm1469_vm0, %v1468_v0 }
 0x1e4   :  { %1267 = vmatprep.subr.mxu0 %v1468_v0  ;;  %1233 = vmatpush3.msra.mxu1 %v55_v15 }
 0x1e5   :  { %1268 = vmatpush3.msra.mxu0 %v1548_v24  ;;  %1234 = vmatprep.subr.mxu1 %v1468_v0 }
 0x1e6   :  { %1269 = vmatprep.subr.mxu0 %v1468_v0  ;;  %1235 = vmatpush3.msra.mxu1 %v54_v17 }
 0x1e7   :  { %1270 = vmatpush3.msra.mxu0 %v1553_v25  ;;  %1236 = vmatprep.subr.mxu1 %v1468_v0 }
 0x1e8   :  { %1271 = vmatprep.subr.mxu0 %v1468_v0  ;;  %1237 = vmatpush3.msra.mxu1 %v53_v19 }
 0x1e9   :  { %1272 = vmatpush3.msra.mxu0 %v1559_v26  ;;  %1238 = vmatprep.subr.mxu1 %v1468_v0 }
 0x1ea   :  { %1273 = vmatprep.subr.mxu0 %v1468_v0  ;;  %1239 = vmatpush3.msra.mxu1 %v52_v21 }
 0x1eb   :  { %1274 = vmatpush3.msra.mxu0 %v1565_v27  ;;  %1240 = vmatprep.subr.mxu1 %v1468_v0 }
 0x1ec   :  { %1275 = vmatprep.subr.mxu0 %v1468_v0  ;;  %1241 = vmatpush3.msra.mxu1 %v51_v23 }
 0x1ed   :  { %1276 = vmatpush3.msra.mxu0 %v1571_v28  ;;  %1242 = vmatprep.subr.mxu1 %v1468_v0 }
 0x1ee   :  { %1277 = vmatprep.subr.mxu0 %v1468_v0  ;;  %1243 = vmatpush3.msra.mxu1 %v50_v32 }
 0x1ef   :  { %1278 = vmatpush3.msra.mxu0 %v1602_v29  ;;  %1282 = vmatprep.subr.mxu1 %v1468_v0 }
 0x1f0   :  { %1317 = vmatprep.subr.mxu0 %v1468_v0 }
 0x28e   :  { %v391_v34 = vpop.f32.mrf.mxu1 }
 0x28f   :  { %v467_v49 = vmul.f32 %v391_v34, %v1610_v31 }
 0x290   :  { %v1176_v50 = vpop.f32.mrf.mxu1  ;;  %v463_v52 = vpop.f32.mrf.mxu0 }
 0x291   :  { %v468_v53 = vadd.f32 %v467_v49, %v463_v52 }
 0x292   :  { %v1211_v55 = vpop.f32.mrf.mxu0 }
 0x293   :  { %v473_v56 = vmul.f32 %v875_v51, %v468_v53 }
 0x295   :  { %v478_v57 = vadd.f32 %v876_v54, %v473_v56 }
 0x297   :  { %vm479_vm2 = vcmp.ge.f32.partialorder %v478_v57, 0.0  ;;  %v480_v58 = vmul.f32 0.22916667, %v478_v57 }
 0x299   :  { %v481_v59 = vsel %vm479_vm2, %v478_v57, %v480_v58 }
 0x29a   :  { %1245 = vmatmul.mubr.f32.vlgmr.msra.gmra.mxu1 %v481_v59 }
 0x29b   :  { %1283 = vmatpush3.msra.mxu1 %v1500_v5  ;;  %1314 = vmatprep.mubr.msk.f32.mxu1 %vm1469_vm0, %v1468_v0 }
 0x29c   :  { %1284 = vmatprep.subr.mxu1 %v1468_v0 }
 0x29d   :  { %1285 = vmatpush3.msra.mxu1 %v1502_v6 }
 0x29e   :  { %1286 = vmatprep.subr.mxu1 %v1468_v0 }
 0x29f   :  { %1287 = vmatpush3.msra.mxu1 %v1507_v8 }
 0x2a0   :  { %1288 = vmatprep.subr.mxu1 %v1468_v0 }
 0x2a1   :  { %1289 = vmatpush3.msra.mxu1 %v1512_v10 }
 0x2a2   :  { %1290 = vmatprep.subr.mxu1 %v1468_v0 }
 0x2a3   :  { %1291 = vmatpush3.msra.mxu1 %v1517_v12 }
 0x2a4   :  { %1292 = vmatprep.subr.mxu1 %v1468_v0 }
 0x2a5   :  { %1293 = vmatpush3.msra.mxu1 %v1522_v14 }
 0x2a6   :  { %1294 = vmatprep.subr.mxu1 %v1468_v0 }
 0x2a7   :  { %1295 = vmatpush3.msra.mxu1 %v1527_v16 }
 0x2a8   :  { %1296 = vmatprep.subr.mxu1 %v1468_v0 }
 0x2a9   :  { %1297 = vmatpush3.msra.mxu1 %v1532_v18 }
 0x2aa   :  { %1298 = vmatprep.subr.mxu1 %v1468_v0 }
 0x2ab   :  { %1299 = vmatpush3.msra.mxu1 %v1537_v20 }
 0x2ac   :  { %1300 = vmatprep.subr.mxu1 %v1468_v0 }
 0x2ad   :  { %1301 = vmatpush3.msra.mxu1 %v1542_v22 }
 0x2ae   :  { %1302 = vmatprep.subr.mxu1 %v1468_v0 }
 0x2af   :  { %1303 = vmatpush3.msra.mxu1 %v1548_v24 }
 0x2b0   :  { %1304 = vmatprep.subr.mxu1 %v1468_v0 }
 0x2b1   :  { %1305 = vmatpush3.msra.mxu1 %v1553_v25 }
 0x2b2   :  { %1306 = vmatprep.subr.mxu1 %v1468_v0 }
 0x2b3   :  { %1307 = vmatpush3.msra.mxu1 %v1559_v26 }
 0x2b4   :  { %1308 = vmatprep.subr.mxu1 %v1468_v0 }
 0x2b5   :  { %1309 = vmatpush3.msra.mxu1 %v1565_v27 }
 0x2b6   :  { %1310 = vmatprep.subr.mxu1 %v1468_v0 }
 0x2b7   :  { %1311 = vmatpush3.msra.mxu1 %v1571_v28 }
 0x2b8   :  { %1312 = vmatprep.subr.mxu1 %v1468_v0 }
 0x2b9   :  { %1313 = vmatpush3.msra.mxu1 %v1602_v29 }
 0x2ba   :  { %1352 = vmatprep.subr.mxu1 %v1468_v0 }
 0x35a   :  { %v1800_v5 = vpop.f32.mrf.mxu1 }
 0x35b   :  { %v622_v6 = vmul.f32 %v1800_v5, %v1800_v5  ;;  %1280 = vmatmul.mubr.f32.vlgmr.msra.gmra.mxu0 %v1800_v5 }
 0x35c   :  { %v1246_v8 = vpop.f32.mrf.mxu1  ;;  %1318 = vmatpush3.msra.mxu0 %v1608_v30  ;;  %1349 = vmatprep.mubr.msk.f32.mxu0 %vm1469_vm0, %v1468_v0 }
 0x35d   :  { %1315 = vmatmul.mubr.f32.vlgmr.msra.gmra.mxu1 %v622_v6  ;;  %1319 = vmatprep.subr.mxu0 %v1468_v0 }
 0x35e   :  { %1320 = vmatpush3.msra.mxu0 %v1615_v33  ;;  %1353 = vmatpush3.msra.mxu1 %v1608_v30 }
 0x35f   :  { %1321 = vmatprep.subr.mxu0 %v1468_v0  ;;  %1354 = vmatprep.subr.mxu1 %v1468_v0 }
 0x360   :  { %1322 = vmatpush3.msra.mxu0 %v1621_v35  ;;  %1355 = vmatpush3.msra.mxu1 %v1615_v33  ;;  %v877_v33 = vld [vmem:[#allocation5 + $0xe2] ss:$0 sm:$0xff] }
 0x361   :  { %1323 = vmatprep.subr.mxu0 %v1468_v0  ;;  %1356 = vmatprep.subr.mxu1 %v1468_v0 }
 0x362   :  { %1324 = vmatpush3.msra.mxu0 %v1635_v36  ;;  %1357 = vmatpush3.msra.mxu1 %v1621_v35 }
 0x363   :  { %1325 = vmatprep.subr.mxu0 %v1468_v0  ;;  %1358 = vmatprep.subr.mxu1 %v1468_v0 }
 0x364   :  { %1326 = vmatpush3.msra.mxu0 %v1640_v37  ;;  %1359 = vmatpush3.msra.mxu1 %v1635_v36 }
 0x365   :  { %1327 = vmatprep.subr.mxu0 %v1468_v0  ;;  %1360 = vmatprep.subr.mxu1 %v1468_v0 }
 0x366   :  { %1328 = vmatpush3.msra.mxu0 %v1646_v38  ;;  %1361 = vmatpush3.msra.mxu1 %v1640_v37  ;;  %v878_v37 = vld [vmem:[#allocation5 + $0xe3] ss:$0 sm:$0xff] }
 0x367   :  { %1329 = vmatprep.subr.mxu0 %v1468_v0  ;;  %1362 = vmatprep.subr.mxu1 %v1468_v0 }
 0x368   :  { %1330 = vmatpush3.msra.mxu0 %v1652_v39  ;;  %1363 = vmatpush3.msra.mxu1 %v1646_v38 }
 0x369   :  { %1331 = vmatprep.subr.mxu0 %v1468_v0  ;;  %1364 = vmatprep.subr.mxu1 %v1468_v0 }
 0x36a   :  { %1332 = vmatpush3.msra.mxu0 %v1658_v40  ;;  %1365 = vmatpush3.msra.mxu1 %v1652_v39 }
 0x36b   :  { %1333 = vmatprep.subr.mxu0 %v1468_v0  ;;  %1366 = vmatprep.subr.mxu1 %v1468_v0 }
 0x36c   :  { %1334 = vmatpush3.msra.mxu0 %v1664_v41  ;;  %1367 = vmatpush3.msra.mxu1 %v1658_v40 }
 0x36d   :  { %1335 = vmatprep.subr.mxu0 %v1468_v0  ;;  %1368 = vmatprep.subr.mxu1 %v1468_v0 }
 0x36e   :  { %1336 = vmatpush3.msra.mxu0 %v1670_v42  ;;  %1369 = vmatpush3.msra.mxu1 %v1664_v41 }
 0x36f   :  { %1337 = vmatprep.subr.mxu0 %v1468_v0  ;;  %1370 = vmatprep.subr.mxu1 %v1468_v0 }
 0x370   :  { %1338 = vmatpush3.msra.mxu0 %v1673_v43  ;;  %1371 = vmatpush3.msra.mxu1 %v1670_v42 }
 0x371   :  { %1339 = vmatprep.subr.mxu0 %v1468_v0  ;;  %1372 = vmatprep.subr.mxu1 %v1468_v0 }
 0x372   :  { %1340 = vmatpush3.msra.mxu0 %v1679_v44  ;;  %1373 = vmatpush3.msra.mxu1 %v1673_v43 }
 0x373   :  { %1341 = vmatprep.subr.mxu0 %v1468_v0  ;;  %1374 = vmatprep.subr.mxu1 %v1468_v0 }
 0x374   :  { %1342 = vmatpush3.msra.mxu0 %v1685_v45  ;;  %1375 = vmatpush3.msra.mxu1 %v1679_v44 }
 0x375   :  { %1343 = vmatprep.subr.mxu0 %v1468_v0  ;;  %1376 = vmatprep.subr.mxu1 %v1468_v0 }
 0x376   :  { %1344 = vmatpush3.msra.mxu0 %v1691_v46  ;;  %1377 = vmatpush3.msra.mxu1 %v1685_v45 }
 0x377   :  { %1345 = vmatprep.subr.mxu0 %v1468_v0  ;;  %1378 = vmatprep.subr.mxu1 %v1468_v0 }
 0x378   :  { %1346 = vmatpush3.msra.mxu0 %v1697_v47  ;;  %1379 = vmatpush3.msra.mxu1 %v1691_v46 }
 0x379   :  { %1347 = vmatprep.subr.mxu0 %v1468_v0  ;;  %1380 = vmatprep.subr.mxu1 %v1468_v0 }
 0x37a   :  { %1348 = vmatpush3.msra.mxu0 %v1703_v48  ;;  %1381 = vmatpush3.msra.mxu1 %v1697_v47 }
 0x37b   :  { %1382 = vmatprep.subr.mxu1 %v1468_v0  ;;  %1384 = vmatprep.mubr.msk.f32.mxu1 %vm1469_vm0, %v1468_v0 }
 0x37c   :  { %1383 = vmatpush3.msra.mxu1 %v1703_v48 }
 0x41b   :  { %v618_v10 = vpop.f32.mrf.mxu0 }
 0x41c   :  { %v693_v12 = vmul.f32 0.25, %v618_v10 }
 0x41d   :  { %v1281_v14 = vpop.f32.mrf.mxu0  ;;  %v689_v16 = vpop.f32.mrf.mxu1 }
 0x41e   :  { %v695_v18 = vmul.f32 %v693_v12, %v693_v12  ;;  %v694_v20 = vmul.f32 0.25, %v689_v16  ;;  %v770_v27 = vsub.f32 0.0, %v693_v12 }
 0x41f   :  { %v1316_v22 = vpop.f32.mrf.mxu1 }
 0x420   :  { %v696_v24 = vsub.f32 %v694_v20, %v695_v18 }
 0x422   :  { %v697_v25 = vmax.f32 %v696_v24, 0.0 }
 0x424   :  { %v698_v26 = vadd.f32 1e-05, %v697_v25 }
 0x426   :  { %1396 = vrsqrt.f32 %v698_v26 }
 0x433   :  { %v1397_v28 = vpop.eup %1396 }
 0x434   :  { %1350 = vmatmul.mubr.f32.vlgmr.msra.gmra.mxu0 %v1397_v28  ;;  %v771_v29 = vmul.f32 %v1397_v28, %v770_v27 }
 0x436   :  { %1385 = vmatmul.mubr.f32.vlgmr.msra.gmra.mxu1 %v771_v29 }
 0x4f4   :  { %v766_v30 = vpop.f32.mrf.mxu0 }
 0x4f5   :  { %v842_v0 = vmul.f32 %v766_v30, %v1800_v5 }
 0x4f6   :  { %v1351_v31 = vpop.f32.mrf.mxu0  ;;  %v838_v35 = vpop.f32.mrf.mxu1 }
 0x4f7   :  { %v843_v36 = vadd.f32 %v842_v0, %v838_v35 }
 0x4f8   :  { %v1386_v38 = vpop.f32.mrf.mxu1 }
 0x4f9   :  { %v848_v39 = vmul.f32 %v877_v33, %v843_v36 }
 0x4fb   :  { %v853_v40 = vadd.f32 %v878_v37, %v848_v39 }
 0x4fd   :  { %vm854_vm3 = vcmp.ge.f32.partialorder %v853_v40, 0.0  ;;  %v855_v41 = vmul.f32 0.22916667, %v853_v40 }
 0x4ff   :  { %v856_v42 = vsel %vm854_vm3, %v853_v40, %v855_v41 }
 0x500   :  { %857 = vst [vmem:[#allocation7] sm:$0xff] %v856_v42 }
 0x501   :  { %1449 = shalt.err (!%p1446_p0)
}
 0x502   :  { %867 = dma.vmem_to_hbm [thread:$0]  %s865_s1, 128, %s1877_s2, [#allocation4]  }
 0x503   :  { %1462 = dma.done.wait [#allocation4], 128  }
 0x504   :  { %1463 = vsyncadd [#allocation4], 4294967168 }
 0x505   :  { %871 = vsyncpa [#allocation3], 1 }
 0x506   :  { %872 = vsyncpa [#allocation6], 1 }
 0x507   :  { %873 = vsyncpa [#allocation4], 1 }

</bundles_post_ra>
